<compile_context>
chip_gen: v5e
topology: v5e:2x2
jax: 0.10.0
libtpu: 0.0.40
codegen_flags: <defaults>
</compile_context>

<pallas_src>
import math

import jax
import jax.numpy as jnp
from jax import lax
from jax.experimental import pallas as pl
from jax.experimental.pallas import tpu as pltpu


def calc_tf_padding(height, width, kernel_size=3, stride=2, dilation=1):
    """pytorchcv's calc_tf_padding: (pad_h_top, pad_h_bot, pad_w_left, pad_w_right)."""
    oh = math.ceil(height / stride)
    ow = math.ceil(width / stride)
    pad_h = max((oh - 1) * stride + (kernel_size - 1) * dilation + 1 - height, 0)
    pad_w = max((ow - 1) * stride + (kernel_size - 1) * dilation + 1 - width, 0)
    return (pad_h // 2, pad_h - pad_h // 2, pad_w // 2, pad_w - pad_w // 2)


def _tf_mode_hw_padding(h, w, kernel_size=3, stride=2):
    """Padding actually applied by the PyTorch module in tf_mode.

    F.pad(x, (a, b, c, d)) pads the LAST dim (W) with (a, b) and H with (c, d),
    so the module applies pad_h to W and pad_w to H.  Returns (pt, pb, pl, pr).
    """
    a, b, c, d = calc_tf_padding(h, w, kernel_size, stride)
    return c, d, a, b


def _round_up(v, m):
    return -(-v // m) * m


def _effi_init_block_kernel(p_ref, w_ref, b_ref, o_ref):
    """Fused (folded-BN) 3x3/stride-2 conv + bias + ReLU for one spatial tile.

    p_ref: (1, K, TS)   im2col patches, K = 9*Cin, spatial positions on lanes.
    w_ref: (Cout, K)    conv weight with BN scale folded in.
    b_ref: (Cout, 1)    folded BN bias (f32).
    o_ref: (1, Cout, TS)
    """
    acc = jnp.dot(w_ref[...], p_ref[0],
                  preferred_element_type=jnp.float32)        # single MXU matmul
    y = jnp.maximum(acc + b_ref[...], 0.0)                   # BN bias + ReLU, f32
    o_ref[0] = y.astype(o_ref.dtype)


def effi_init_block(x_nchw, weight, gamma, beta, running_mean, running_var,
                    bn_eps=1e-5, tf_mode=True, compute_dtype=jnp.bfloat16):
    """EffiInitBlock forward.  Input is NCHW; output is NCHW in compute_dtype.

    (Cast the result back to f32 in the caller only if the consumer needs it.)
    """
    n, cin, h, w_dim = x_nchw.shape
    cout = weight.shape[0]
    k, stride = 3, 2

    if tf_mode:
        pt, pb, plft, prt = _tf_mode_hw_padding(h, w_dim, k, stride)
    else:
        pt = pb = plft = prt = 1

    hp = h + pt + pb
    wp = w_dim + plft + prt
    ho = (hp - k) // stride + 1
    wo = (wp - k) // stride + 1
    s = ho * wo
    k_dim = 9 * cin

    # ---------------- wrapper glue: pad + im2col, all in compute_dtype -------
    x = x_nchw.astype(compute_dtype)
    x_pad = jnp.pad(x, ((0, 0), (0, 0), (pt, pb), (plft, prt)))

    # Build patches directly in (N, K, S) from NCHW — no layout transposes.
    taps = []
    for kh in range(3):
        for kw in range(3):
            taps.append(x_pad[:, :,
                              kh:kh + 2 * (ho - 1) + 1:2,
                              kw:kw + 2 * (wo - 1) + 1:2])    # (N, Cin, Ho, Wo)
    patches = jnp.stack(taps, axis=1)                         # (N, 9, Cin, Ho, Wo)
    patches = patches.reshape(n, k_dim, s)                    # K order = (kh, kw, cin)

    # ---------------- tiling: big, (near-)padding-free lane tiles ------------
    s_128 = _round_up(s, 128)
    ts_max = 8192
    n_tiles = max(1, -(-s_128 // ts_max))
    # Keep >=2 grid points overall so v7x's two TensorCores both get work even
    # at batch 1 (one extra ~0.35us step is negligible on single-TC chips).
    if n * n_tiles < 2 and s_128 >= 256:
        n_tiles = 2
    ts = _round_up(-(-s_128 // n_tiles), 128)
    s_pad = ts * n_tiles

    patches = jnp.pad(patches, ((0, 0), (0, 0), (0, s_pad - s)))

    # weight (Cout, Cin, 3, 3) -> (Cout, 9*Cin), tap order (kh, kw, cin);
    # fold BN scale into the weights (f32), keep bias in f32.
    w_mat = jnp.transpose(weight, (0, 2, 3, 1)).reshape(cout, k_dim)
    inv_std = 1.0 / jnp.sqrt(running_var + bn_eps)
    scale = gamma * inv_std                                    # (Cout,)
    bias = (beta - running_mean * scale).reshape(cout, 1).astype(jnp.float32)
    w_mat = (w_mat * scale[:, None]).astype(compute_dtype)

    elt = jnp.dtype(compute_dtype).itemsize
    cost = pl.CostEstimate(
        flops=2 * n * cout * k_dim * s_pad,
        transcendentals=0,
        bytes_accessed=(n * k_dim * s_pad * elt            # patches read
                        + cout * k_dim * elt               # weights read
                        + cout * 4                          # bias read
                        + n * cout * s_pad * elt))          # output write

    out_flat = pl.pallas_call(
        _effi_init_block_kernel,
        out_shape=jax.ShapeDtypeStruct((n, cout, s_pad), compute_dtype),
        grid=(n, n_tiles),
        in_specs=[
            pl.BlockSpec((1, k_dim, ts), lambda i, j: (i, 0, j)),
            pl.BlockSpec((cout, k_dim), lambda i, j: (0, 0)),
            pl.BlockSpec((cout, 1), lambda i, j: (0, 0)),
        ],
        out_specs=pl.BlockSpec((1, cout, ts), lambda i, j: (i, 0, j)),
        compiler_params=pltpu.CompilerParams(
            dimension_semantics=("parallel", "parallel")),
        cost_estimate=cost,
    )(patches, w_mat, bias)

    # (N, Cout, S_pad) -> (N, Cout, Ho, Wo): already NCHW-ordered, just slice.
    return out_flat[:, :, :s].reshape(n, cout, ho, wo)


def _reference(x_nchw, weight, gamma, beta, running_mean, running_var,
               bn_eps=1e-5, tf_mode=True):
    """Plain-JAX reference matching the PyTorch module (eval-mode BN + ReLU)."""
    n, cin, h, w_dim = x_nchw.shape
    if tf_mode:
        pt, pb, plft, prt = _tf_mode_hw_padding(h, w_dim, 3, 2)
    else:
        pt = pb = plft = prt = 1
    x_p = jnp.pad(x_nchw, ((0, 0), (0, 0), (pt, pb), (plft, prt)))
    conv = lax.conv_general_dilated(
        x_p, weight, window_strides=(2, 2), padding="VALID",
        dimension_numbers=("NCHW", "OIHW", "NCHW"))
    c = conv.shape[1]
    bn = (conv - running_mean.reshape(1, c, 1, 1)) / jnp.sqrt(
        running_var.reshape(1, c, 1, 1) + bn_eps)
    bn = bn * gamma.reshape(1, c, 1, 1) + beta.reshape(1, c, 1, 1)
    return jnp.maximum(bn, 0.0)


if __name__ == "__main__":
    # Small shapes consistent with the module: RGB input, stride-2 stem.
    N, CIN, H, W = 2, 3, 16, 16
    COUT = 32
    BN_EPS = 1e-5
    TF_MODE = True

    key = jax.random.PRNGKey(0)
    k1, k2, k3, k4, k5, k6 = jax.random.split(key, 6)
    weight = jax.random.normal(k1, (COUT, CIN, 3, 3), jnp.float32) * 0.1
    gamma = jax.random.uniform(k2, (COUT,), jnp.float32, 0.5, 1.5)
    beta = jax.random.normal(k3, (COUT,), jnp.float32) * 0.1
    running_mean = jax.random.normal(k4, (COUT,), jnp.float32) * 0.1
    running_var = jax.random.uniform(k5, (COUT,), jnp.float32, 0.5, 1.5)
    x = jax.random.normal(k6, (N, CIN, H, W), jnp.float32)

    ref = _reference(x, weight, gamma, beta, running_mean, running_var,
                     bn_eps=BN_EPS, tf_mode=TF_MODE)

    # f32 MXU operands + f32 output: tight check.
    out_f32 = effi_init_block(x, weight, gamma, beta, running_mean, running_var,
                              bn_eps=BN_EPS, tf_mode=TF_MODE,
                              compute_dtype=jnp.float32)
    out_f32 = jax.block_until_ready(out_f32)
    assert out_f32.shape == (N, COUT, H // 2, W // 2), out_f32.shape
    assert jnp.allclose(out_f32, ref, atol=1e-4, rtol=1e-4), "f32 mismatch"

    # bf16 fast path (default on v6e/v7x): bf16 operands + bf16 output.
    out_bf16 = effi_init_block(x, weight, gamma, beta, running_mean, running_var,
                               bn_eps=BN_EPS, tf_mode=TF_MODE,
                               compute_dtype=jnp.bfloat16)
    out_bf16 = jax.block_until_ready(out_bf16)
    assert out_bf16.shape == (N, COUT, H // 2, W // 2), out_bf16.shape
    assert jnp.allclose(out_bf16.astype(jnp.float32), ref,
                        atol=3e-2, rtol=3e-2), "bf16 mismatch"

    # TODO(synk): training-mode BatchNorm (batch statistics) not implemented;
    # kernel folds eval-mode running stats into the weights/bias like inference.
    print("KERNEL_OK")
</pallas_src>

<mosaic_0001>
module attributes {stable_mosaic.version = 11 : i64} {
  func.func @_effi_init_block_kernel(%arg0: i32, %arg1: i32, %arg2: memref<1x27x128xf32, #tpu.memory_space<vmem>>, %arg3: memref<32x27xf32, #tpu.memory_space<vmem>>, %arg4: memref<32x1xf32, #tpu.memory_space<vmem>>, %arg5: memref<1x32x128xf32, #tpu.memory_space<vmem>>) attributes {dimension_semantics = [#tpu.dimension_semantics<parallel>, #tpu.dimension_semantics<parallel>], iteration_bounds = array<i64: 2, 1>, scalar_prefetch = 0 : i64, scratch_operands = 0 : i64, tpu.core_type = #tpu.core_type<tc>, window_params = [{transform_indices = @transform_0, window_bounds = array<i64: 1, 27, 128>}, {pipeline_mode = #tpu.pipeline_mode<synchronous>, transform_indices = @transform_1, window_bounds = array<i64: 32, 27>}, {pipeline_mode = #tpu.pipeline_mode<synchronous>, transform_indices = @transform_2, window_bounds = array<i64: 32, 1>}, {transform_indices = @transform_3, window_bounds = array<i64: 1, 32, 128>}]} {
    %c0 = arith.constant 0 : index
    %c0_0 = arith.constant 0 : index
    %0 = vector.load %arg3[%c0, %c0_0] : memref<32x27xf32, #tpu.memory_space<vmem>>, vector<32x27xf32>
    %c0_1 = arith.constant 0 : index
    %c0_2 = arith.constant 0 : index
    %c0_3 = arith.constant 0 : index
    %1 = vector.load %arg2[%c0_1, %c0_2, %c0_3] : memref<1x27x128xf32, #tpu.memory_space<vmem>>, vector<1x27x128xf32>
    %2 = vector.shape_cast %1 : vector<1x27x128xf32> to vector<27x128xf32>
    %cst = arith.constant dense<0.000000e+00> : vector<32x128xf32>
    %3 = tpu.matmul %0, %2, %cst {dimension_numbers = #tpu.dot_dimension_numbers<[1], [0], [0], [1], [0, 0, 1, 1], [], []>} : vector<32x27xf32>, vector<27x128xf32>, vector<32x128xf32> -> vector<32x128xf32>
    %c0_4 = arith.constant 0 : index
    %c0_5 = arith.constant 0 : index
    %4 = vector.load %arg4[%c0_4, %c0_5] : memref<32x1xf32, #tpu.memory_space<vmem>>, vector<32x1xf32>
    %5 = vector.broadcast %4 : vector<32x1xf32> to vector<32x128xf32>
    %6 = arith.addf %3, %5 : vector<32x128xf32>
    %cst_6 = arith.constant 0.000000e+00 : f32
    %7 = vector.broadcast %cst_6 : f32 to vector<32x128xf32>
    %8 = arith.maximumf %6, %7 : vector<32x128xf32>
    %c0_7 = arith.constant 0 : index
    %c0_8 = arith.constant 0 : index
    %c0_9 = arith.constant 0 : index
    %9 = vector.load %arg5[%c0_7, %c0_8, %c0_9] : memref<1x32x128xf32, #tpu.memory_space<vmem>>, vector<1x32x128xf32>
    %10 = vector.shape_cast %9 : vector<1x32x128xf32> to vector<32x128xf32>
    %11 = vector.shape_cast %8 : vector<32x128xf32> to vector<1x32x128xf32>
    tpu.vector_store %arg5[%c0_7, %c0_8, %c0_9], %11 {strides = array<i32>} : memref<1x32x128xf32, #tpu.memory_space<vmem>>, vector<1x32x128xf32>,
    return
  }
  func.func @transform_0(%arg0: i32, %arg1: i32) -> (i32, i32, i32) {
    %c0_i32 = arith.constant 0 : i32
    %c0_i32_0 = arith.constant 0 : i32
    return %arg0, %c0_i32, %arg1 : i32, i32, i32
  }
  func.func @transform_1(%arg0: i32, %arg1: i32) -> (i32, i32) {
    %c0_i32 = arith.constant 0 : i32
    %c0_i32_0 = arith.constant 0 : i32
    %c0_i32_1 = arith.constant 0 : i32
    return %c0_i32, %c0_i32_0 : i32, i32
  }
  func.func @transform_2(%arg0: i32, %arg1: i32) -> (i32, i32) {
    %c0_i32 = arith.constant 0 : i32
    %c0_i32_0 = arith.constant 0 : i32
    %c0_i32_1 = arith.constant 0 : i32
    return %c0_i32, %c0_i32_0 : i32, i32
  }
  func.func @transform_3(%arg0: i32, %arg1: i32) -> (i32, i32, i32) {
    %c0_i32 = arith.constant 0 : i32
    %c0_i32_0 = arith.constant 0 : i32
    return %arg0, %c0_i32, %arg1 : i32, i32, i32
  }
}

</mosaic_0001>

<bundles_post_ra>
// kernel: tpu_custom_call.1
= control target key start
LH: loop header
LB: loop body
LE: loop exit
PB: predicated region body
PF: predicated region fallthrough
CT: control target
= control target key end

     0   :  { %8 = vsyncpa [#allocation3], 0  ;;  %s691_s0 = inlined_call_operand.vmem [shape: f32[2,27,128], index: 0, kind: input, shape index: {}]   ;;  %s692_s1 = inlined_call_operand.vmem [shape: f32[32,27], index: 1, kind: input, shape index: {}]   ;;  %s693_s2 = inlined_call_operand.vmem [shape: f32[32,1], index: 2, kind: input, shape index: {}]   ;;  %s694_s3 = inlined_call_operand.hbm [shape: f32[2,32,128], index: 3, kind: output, shape index: {}]  }
   0x1   :  { %10 = vsyncpa [#allocation3 + $0x1], 0  ;;  %s570_s12 = smov 0   ;;  %s572_s13 = smov 0  }
   0x2   :  { %s574_s14 = smov 0   ;;  %s576_s15 = smov 0  }
   0x3   :  { %s578_s16 = smov 0   ;;  %s580_s17 = smov 0  }
   0x4 LB: > { %s375_s18 = sadd.s32 4294967295, %s545_s17   ;;  %s376_s19 = sadd.s32 4294967294, %s545_s17   ;;  %s545_s17 = sphi %s580_s17, %s16_s17   ;;  %s541_s16 = sphi %s578_s16, %s701_s16   ;;  %s537_s15 = sphi %s576_s15, %s700_s15   ;;  %s533_s14 = sphi %s574_s14, %s699_s14   ;;  %s529_s13 = sphi %s572_s13, %s698_s13   ;;  %s525_s12 = sphi %s570_s12, %s697_s12  }
   0x5   : > { %s28_s20 = sadd.s32 1, %s541_s16  ;;  %s107_s21 = sadd.s32 1, %s533_s14 }
   0x6   : > { %p30_p0 = scmp.ge.s32.totalorder %s28_s20, 2  ;;  %p117_p1 = scmp.ne.s32.totalorder %s533_s14, %s529_s13 }
   0x7   : > { %p118_p2 = scmp.eq.s32.totalorder %s375_s18, 1  ;;  %p123_p3 = scmp.ne.s32.totalorder %s529_s13, %s525_s12 }
   0x8   : > { %s703_s20 = smov (%p30_p0, %s28_s20), 0  ;;  %p124_p5 = scmp.eq.s32.totalorder %s376_s19, 1 }
   0x9   : > { %p610_p4 = por %p118_p2, %p117_p1  ;;  %s102_s23 = ssub.s32 %s541_s16, %s703_s20 }
   0xa   : > { %p379_p6 = scmp.ge.s32.totalorder %s545_s17, 1  ;;  %p105_p7 = scmp.eq.s32.totalorder %s102_s23, 0 }
   0xb   : > { %p617_p8 = por %p124_p5, %p123_p3  ;;  %p159_p9 = scmp.lt.s32.totalorder %s545_s17, 3 }
   0xc   : > { %s623_s25 = scalar_select %p105_p7, %s533_s14, %s107_s21  }
   0xd   : > { %p160_p10 = pnand %p379_p6, %p159_p9 }
   0xe   : > { %p186_p11 = scmp.lt.s32.totalorder (!%p160_p10), %s537_s15, 1  ;;  %s183_s30 = sand.u32 (!%p160_p10), 1, %s529_s13  }
   0xf   : > { %163 = sbr.rel (%p160_p10) target bundleno = 175 (0xaf), region = 32  ;;  %s394_s5 = sshll.u32 (!%p160_p10), %s537_s15, 5 }
  0x10   : > { %s293_s8 = scalar_lea.hbm (!%p160_p10), %s694_s3, %s394_s5  ;;  %s487_s26 = scalar_lea.hbm (!%p160_p10), %s694_s3, 64 }
  0x11   : > { %s296_s11 = sshll.u32 (!%p160_p10), %s293_s8, 4  ;;  %s297_s11 = int_to_ptr.hbm [resolvable:$true] %s296_s11 }
  0x12   : > { %s481_s18 = sshra.s32 (!%p160_p10), %s297_s11, 4  ;;  %s482_s18 = int_to_ptr.hbm [resolvable:$true] %s481_s18 }
  0x13   : > { %s483_s19 = scalar_lea.hbm (!%p160_p10), %s482_s18, 32  ;;  %p488_p1 = scmp.lt.s32.totalorder (!%p160_p10), %s482_s18, %s694_s3 }
  0x14   : > { %v547_v0 = vmov 0   ;;  %v204_v1 = vld [vmem:[%s693_s2 + $0x10] sm:$0xff]  ;;  %s187_s28 = scalar_select %p186_p11, %s537_s15, 1  ;;  %v202_v2 = vld [vmem:[%s693_s2] sm:$0xff]  ;;  %vm239_vm0 = vcmask 1042432   ;;  %vm226_vm1 = vcmask 220160  }
  0x15   : > { %466 = vset.pattern.permute.xlu1 %v547_v0  ;;  %465 = vset.pattern.permute.xlu0 %v547_v0  ;;  %v194_v7 = vld [vmem:[%s692_s1] sm:$0xff]  ;;  %v195_v8 = vld [vmem:[%s692_s1 + $0x8] sm:$0xff]  ;;  %v196_v9 = vld [vmem:[%s692_s1 + $0x10] sm:$0xff]  ;;  %s281_s15 = scalar_lea.sflag [#allocation3], %s183_s30  ;;  %p484_p12 = scmp.ne.s32.totalorder %s482_s18, %s483_s19 }
  0x16   : > { %218 = vperm.xlu1 %466, %v204_v1   ;;  %208 = vperm.xlu0 %465, %v202_v2   ;;  %s393_s4 = sshll.u32 %s187_s28, 5  ;;  %v197_v10 = vld [vmem:[%s692_s1 + $0x18] sm:$0xff]  ;;  %v203_v12 = vld [vmem:[%s693_s2 + $0x8] sm:$0xff]  ;;  %p489_p2 = scmp.lt.s32.totalorder %s487_s26, %s483_s19 }
  0x17   : > { %s193_s7 = scalar_lea.vmem %s691_s0, %s393_s4  ;;  %v205_v11 = vld [vmem:[%s693_s2 + $0x18] sm:$0xff]  ;;  %s380_s4 = sshll.u32 %s183_s30, 5 }
  0x18   : > { %v201_v3 = vld [vmem:[%s193_s7 + $0x18] sm:$0x7]  ;;  %v200_v4 = vld [vmem:[%s193_s7 + $0x10] sm:$0xff]  ;;  %v199_v5 = vld [vmem:[%s193_s7 + $0x8] sm:$0xff]  ;;  %s185_s9 = scalar_lea.vmem [#allocation2], %s380_s4  ;;  %p485_p13 = pnand %p484_p12, %p610_p4 }
  0x19   : > { %383 = vmatpush.msk.msra.mxu0 %vm239_vm0, %v201_v3  ;;  %395 = vmatpush.msk.msra.mxu1 %vm239_vm0, %v201_v3  ;;  %v198_v6 = vld [vmem:[%s193_s7] sm:$0xff]  ;;  %s294_s10 = sshll.u32 %s185_s9, 4  ;;  %p490_p3 = por %p489_p2, %p488_p1  ;;  %s295_s10 = int_to_ptr.vmem [resolvable:$true] %s294_s10 }
  0x1a   : > { %396 = vmatpush.msk.msra.mxu2 %vm239_vm0, %v201_v3  ;;  %397 = vmatpush.msk.msra.mxu3 %vm239_vm0, %v201_v3  ;;  %p486_p0 = pneg %p485_p13 }
  0x1b   : > { %256 = vmatpush.msra.mxu0 %v200_v4  ;;  %398 = vmatpush.msra.mxu1 %v200_v4 }
  0x1c   : > { %399 = vmatpush.msra.mxu2 %v200_v4  ;;  %400 = vmatpush.msra.mxu3 %v200_v4  ;;  %p491_p5 = pnand %p490_p3, %p486_p0 }
  0x1d   : > { %257 = vmatpush.msra.mxu0 %v199_v5  ;;  %401 = vmatpush.msra.mxu1 %v199_v5 }
  0x1e   : > { %402 = vmatpush.msra.mxu2 %v199_v5  ;;  %403 = vmatpush.msra.mxu3 %v199_v5 }
  0x1f   : > { %258 = vmatpush.msra.mxu0 %v198_v6  ;;  %404 = vmatpush.msra.mxu1 %v198_v6 }
  0x20   : > { %405 = vmatpush.msra.mxu2 %v198_v6  ;;  %406 = vmatpush.msra.mxu3 %v198_v6 }
  0x21   : > { %384 = vmatmul.msk.f32.vlgmr.msra.gmra.mxu0 %vm226_vm1, %v194_v7  ;;  %385 = vmatmul.msk.f32.vlgmr.msra.gmra.mxu1 %vm226_vm1, %v195_v8 }
  0x22   : > { %386 = vmatmul.msk.f32.vlgmr.msra.gmra.mxu2 %vm226_vm1, %v196_v9  ;;  %387 = vmatmul.msk.f32.vlgmr.msra.gmra.mxu3 %vm226_vm1, %v197_v10 }
  0x23   : > { %223 = vperm.xlu1 %466, %v205_v11   ;;  %213 = vperm.xlu0 %465, %v203_v12  }
  0x88   : > { %v209_v13 = vpop.permute.xlu0 %208  ;;  %v219_v14 = vpop.permute.xlu1 %218 }
  0x95   : > { %v214_v15 = vpop.permute.xlu0 %213  ;;  %v224_v22 = vpop.permute.xlu1 %223 }
  0x9e   : > { %v260_v16 = vpop.f32.mrf.mxu0  ;;  %v263_v17 = vpop.f32.mrf.mxu1 }
  0x9f   : > { %v261_v18 = vadd.f32 %v260_v16, %v209_v13  ;;  %v264_v19 = vadd.f32 %v263_v17, %v214_v15 }
  0xa1   : > { %v272_v20 = vmax.f32 %v261_v18, 0.0  ;;  %v273_v21 = vmax.f32 %v264_v19, 0.0 }
  0xa3   : > { %276 = vst [vmem:[%s185_s9] sm:$0xff] %v272_v20 }
  0xa4   : > { %277 = vst [vmem:[%s185_s9 + $0x8] sm:$0xff] %v273_v21 }
  0xa5   : > { %v266_v23 = vpop.f32.mrf.mxu2  ;;  %v269_v24 = vpop.f32.mrf.mxu3 }
  0xa6   : > { %v267_v25 = vadd.f32 %v266_v23, %v219_v14  ;;  %v270_v26 = vadd.f32 %v269_v24, %v224_v22 }
  0xa8   : > { %v274_v27 = vmax.f32 %v267_v25, 0.0  ;;  %v275_v28 = vmax.f32 %v270_v26, 0.0 }
  0xaa   : > { %278 = vst [vmem:[%s185_s9 + $0x10] sm:$0xff] %v274_v27 }
  0xab   : > { %279 = vst [vmem:[%s185_s9 + $0x18] sm:$0xff] %v275_v28 }
  0xac   : > { %494 = shalt.err (!%p491_p5)
}
  0xad   : > { %s548_s29 = smov 128   ;;  %s549_s30 = smov 8  }
  0xae   : > { %407 = dma.vmem_to_hbm [thread:$0]  (%p610_p4), %s295_s10, 512, %s297_s11, %s281_s15, %s548_s29, %s548_s29, %s549_s30  }
  0xaf PF: > { %p413_p6 = scmp.ge.s32.totalorder %s545_s17, 2  ;;  %s311_s4 = sand.u32 1, %s525_s12  }
  0xb0   : > { %s312_s5 = scalar_lea.sflag [#allocation3], %s311_s4 }
  0xb1   : > { %p410_p7 = pnand %p413_p6, %p617_p8 }
  0xb3   : > { %p411_p9 = pneg %p410_p7 }
  0xb5   : > { %520 = dma.done.wait (%p411_p9), %s312_s5, 512  }
  0xb6   : > { %522 = vsyncadd (%p411_p9), %s312_s5, 4294966784  ;;  %s16_s17 = sadd.s32 1, %s545_s17   ;;  %s697_s12 = smov %s529_s13 }
  0xb7   : > { %p13_p10 = scmp.ge.s32.totalorder %s16_s17, 4   ;;  %s698_s13 = smov %s533_s14 }
  0xb8   : > { %s699_s14 = smov %s623_s25  ;;  %s700_s15 = smov %s541_s16 }
  0xb9   : > { %s701_s16 = smov %s703_s20  ;;  %15 = sbr.rel (!%p13_p10) target bundleno = 4 (0x4), region = 67 }
  0xbe   :  { %318 = vsyncpa [#allocation3], 1 }
  0xbf   :  { %320 = vsyncpa [#allocation3 + $0x1], 1 }

</bundles_post_ra>
